<compile_context>
chip_gen: v6e
topology: v6e:2x2x1
jax: 0.10.0
libtpu: 0.0.40
codegen_flags: <defaults>
</compile_context>

<pallas_src>
import functools

import jax
import jax.numpy as jnp
from jax.experimental import pallas as pl
from jax.experimental.pallas import tpu as pltpu


def _sliding_sum(xp, kernel_size, out_len):
    """Sliding-window sum of width `kernel_size` along axis 1 (sublanes).

    xp: (BB, out_len + kernel_size - 1, BC).  Dyadic doubling emits only
    O(log k) shifted adds (each ~one sublane roll + one VALU add) instead of
    the k-1 adds of the naive unrolled form.
    """
    pows = {1: xp}
    w = 1
    while 2 * w <= kernel_size:
        prev = pows[w]
        n = prev.shape[1]
        # pows[2w][:, i, :] = sum of xp[:, i : i + 2w, :]
        pows[2 * w] = prev[:, : n - w, :] + prev[:, w:, :]
        w *= 2

    # Combine the binary decomposition of kernel_size.
    acc = None
    offset = 0
    rem = kernel_size
    for w in sorted(pows.keys(), reverse=True):
        if rem >= w:
            part = pows[w][:, offset:offset + out_len, :]
            acc = part if acc is None else acc + part
            offset += w
            rem -= w
    return acc


def _decomp_kernel(x_ref, res_ref, mean_ref, *, kernel_size, pad):
    # x_ref:    (BB, L, BC)  input block; seq axis on sublanes, channels on lanes.
    # res_ref:  (BB, L, BC)  seasonal component (x - moving_mean)
    # mean_ref: (BB, L, BC)  trend component (moving average)
    x = x_ref[...].astype(jnp.float32)
    L = x.shape[1]

    # In-kernel reflect padding along the sequence (sublane) axis:
    #   [x[pad], ..., x[1], x[0], ..., x[L-1], x[L-2], ..., x[L-1-pad]]
    if pad > 0:
        head = [x[:, j:j + 1, :] for j in range(pad, 0, -1)]
        tail = [x[:, j:j + 1, :] for j in range(L - 2, L - 2 - pad, -1)]
        xp = jnp.concatenate(head + [x] + tail, axis=1)   # (BB, L + 2*pad, BC)
    else:
        xp = x

    mean = _sliding_sum(xp, kernel_size, L) * (1.0 / kernel_size)
    res = x - mean

    mean_ref[...] = mean.astype(mean_ref.dtype)
    res_ref[...] = res.astype(res_ref.dtype)


@functools.partial(jax.jit, static_argnames=("kernel_size",))
def series_decomp(x, kernel_size):
    """x: (B, L, C).  Returns (res, moving_mean), each (B, L, C)."""
    assert kernel_size % 2 == 1, "kernel_size should be odd"
    B, L, C = x.shape
    pad = (kernel_size - 1) // 2
    assert L > pad, "reflect padding requires L > (kernel_size - 1) // 2"

    # Channel (lane) chunking: keep the lane axis a dense multiple of 128
    # whenever C allows it; otherwise take the full channel axis (block dim
    # equal to the full array dim is always legal).
    if C % 128 == 0:
        bc = 128
        while bc * 2 <= min(C, 512) and C % (bc * 2) == 0:
            bc *= 2
    else:
        bc = C

    # Batch folding: target ~2 MiB per block array (f32) so DMA bandwidth is
    # well utilized while staying well inside the 32 MiB scoped-VMEM budget
    # (3 arrays double-buffered + ~5 block-sized in-kernel temporaries).
    bytes_per_batch = L * bc * 4
    target_bb = max(1, (2 * 1024 * 1024) // max(bytes_per_batch, 1))
    bb = 1
    for d in range(1, B + 1):
        if B % d == 0 and d <= target_bb:
            bb = d

    # TODO(synk): very long sequences with B == 1 and C <= 128 would need an
    # L-chunked (halo'd) variant; current blocks keep the full L axis resident.

    grid = (B // bb, C // bc)
    kernel = functools.partial(_decomp_kernel, kernel_size=kernel_size, pad=pad)

    res, mean = pl.pallas_call(
        kernel,
        out_shape=(
            jax.ShapeDtypeStruct((B, L, C), x.dtype),
            jax.ShapeDtypeStruct((B, L, C), x.dtype),
        ),
        grid_spec=pltpu.PrefetchScalarGridSpec(
            num_scalar_prefetch=0,
            grid=grid,
            in_specs=[pl.BlockSpec((bb, L, bc), lambda i, j: (i, 0, j))],
            out_specs=[
                pl.BlockSpec((bb, L, bc), lambda i, j: (i, 0, j)),
                pl.BlockSpec((bb, L, bc), lambda i, j: (i, 0, j)),
            ],
        ),
        compiler_params=pltpu.CompilerParams(
            dimension_semantics=("parallel", "parallel"),
            vmem_limit_bytes=32 * 1024 * 1024,
        ),
    )(x)
    return res, mean


def _reference(x, kernel_size):
    """Pure-JAX reference mirroring the PyTorch forward (reflect padding)."""
    pad = (kernel_size - 1) // 2
    x_t = jnp.transpose(x, (0, 2, 1))
    x_pad = jnp.pad(x_t, ((0, 0), (0, 0), (pad, pad)), mode="reflect")
    L = x.shape[1]
    mean = sum(x_pad[:, :, j:j + L] for j in range(kernel_size)) / kernel_size
    res = x_t - mean
    return jnp.transpose(res, (0, 2, 1)), jnp.transpose(mean, (0, 2, 1))


if __name__ == "__main__":
    # Primary small case matching the module's (B, L, C) input.
    B, L, C = 2, 16, 4
    kernel_size = 5
    x = jax.random.normal(jax.random.PRNGKey(0), (B, L, C), dtype=jnp.float32)

    res, mean = series_decomp(x, kernel_size)
    jax.block_until_ready((res, mean))

    res_want, mean_want = _reference(x, kernel_size)
    assert res.shape == (B, L, C) and mean.shape == (B, L, C)
    assert jnp.allclose(res, res_want, atol=1e-5), "res mismatch (small case)"
    assert jnp.allclose(mean, mean_want, atol=1e-5), "mean mismatch (small case)"

    # Lane-dense case (C a multiple of 128) with the Autoformer-default k=25.
    B2, L2, C2 = 1, 96, 128
    x2 = jax.random.normal(jax.random.PRNGKey(1), (B2, L2, C2), dtype=jnp.float32)
    res2, mean2 = series_decomp(x2, 25)
    jax.block_until_ready((res2, mean2))

    res2_want, mean2_want = _reference(x2, 25)
    assert jnp.allclose(res2, res2_want, atol=1e-5), "res mismatch (lane-dense case)"
    assert jnp.allclose(mean2, mean2_want, atol=1e-5), "mean mismatch (lane-dense case)"

    # k=1 degenerate case (mean == x, res == 0).
    res3, mean3 = series_decomp(x, 1)
    jax.block_until_ready((res3, mean3))
    assert jnp.allclose(mean3, x, atol=1e-6) and jnp.allclose(res3, 0.0, atol=1e-6)

    print("KERNEL_OK")
</pallas_src>

<mosaic_0001>
module attributes {stable_mosaic.version = 11 : i64} {
  func.func @_decomp_kernel(%arg0: i32, %arg1: i32, %arg2: memref<2x16x4xf32, #tpu.memory_space<vmem>>, %arg3: memref<2x16x4xf32, #tpu.memory_space<vmem>>, %arg4: memref<2x16x4xf32, #tpu.memory_space<vmem>>) attributes {dimension_semantics = [#tpu.dimension_semantics<parallel>, #tpu.dimension_semantics<parallel>], iteration_bounds = array<i64: 1, 1>, scalar_prefetch = 0 : i64, scratch_operands = 0 : i64, tpu.core_type = #tpu.core_type<tc>, window_params = [{transform_indices = @transform_0, window_bounds = array<i64: 2, 16, 4>}, {transform_indices = @transform_1, window_bounds = array<i64: 2, 16, 4>}, {transform_indices = @transform_2, window_bounds = array<i64: 2, 16, 4>}]} {
    %c0 = arith.constant 0 : index
    %c0_0 = arith.constant 0 : index
    %c0_1 = arith.constant 0 : index
    %0 = vector.load %arg2[%c0, %c0_0, %c0_1] : memref<2x16x4xf32, #tpu.memory_space<vmem>>, vector<2x16x4xf32>
    %1 = vector.extract_strided_slice %0 {offsets = [0, 2, 0], sizes = [2, 1, 4], strides = [1, 1, 1]} : vector<2x16x4xf32> to vector<2x1x4xf32>
    %2 = vector.extract_strided_slice %0 {offsets = [0, 1, 0], sizes = [2, 1, 4], strides = [1, 1, 1]} : vector<2x16x4xf32> to vector<2x1x4xf32>
    %3 = vector.extract_strided_slice %0 {offsets = [0, 14, 0], sizes = [2, 1, 4], strides = [1, 1, 1]} : vector<2x16x4xf32> to vector<2x1x4xf32>
    %4 = vector.extract_strided_slice %0 {offsets = [0, 13, 0], sizes = [2, 1, 4], strides = [1, 1, 1]} : vector<2x16x4xf32> to vector<2x1x4xf32>
    %5 = tpu.concatenate %1, %2, %0, %3, %4 in 1 : vector<2x1x4xf32>, vector<2x1x4xf32>, vector<2x16x4xf32>, vector<2x1x4xf32>, vector<2x1x4xf32> -> vector<2x20x4xf32>
    %6 = vector.extract_strided_slice %5 {offsets = [0, 0, 0], sizes = [2, 19, 4], strides = [1, 1, 1]} : vector<2x20x4xf32> to vector<2x19x4xf32>
    %7 = vector.extract_strided_slice %5 {offsets = [0, 1, 0], sizes = [2, 19, 4], strides = [1, 1, 1]} : vector<2x20x4xf32> to vector<2x19x4xf32>
    %8 = arith.addf %6, %7 : vector<2x19x4xf32>
    %9 = vector.extract_strided_slice %8 {offsets = [0, 0, 0], sizes = [2, 17, 4], strides = [1, 1, 1]} : vector<2x19x4xf32> to vector<2x17x4xf32>
    %10 = vector.extract_strided_slice %8 {offsets = [0, 2, 0], sizes = [2, 17, 4], strides = [1, 1, 1]} : vector<2x19x4xf32> to vector<2x17x4xf32>
    %11 = arith.addf %9, %10 : vector<2x17x4xf32>
    %12 = vector.extract_strided_slice %11 {offsets = [0, 0, 0], sizes = [2, 16, 4], strides = [1, 1, 1]} : vector<2x17x4xf32> to vector<2x16x4xf32>
    %13 = vector.extract_strided_slice %5 {offsets = [0, 4, 0], sizes = [2, 16, 4], strides = [1, 1, 1]} : vector<2x20x4xf32> to vector<2x16x4xf32>
    %14 = arith.addf %12, %13 : vector<2x16x4xf32>
    %cst = arith.constant 2.000000e-01 : f32
    %15 = vector.broadcast %cst : f32 to vector<2x16x4xf32>
    %16 = arith.mulf %14, %15 : vector<2x16x4xf32>
    %17 = arith.subf %0, %16 : vector<2x16x4xf32>
    %c0_2 = arith.constant 0 : index
    %c0_3 = arith.constant 0 : index
    %c0_4 = arith.constant 0 : index
    %18 = vector.load %arg4[%c0_2, %c0_3, %c0_4] : memref<2x16x4xf32, #tpu.memory_space<vmem>>, vector<2x16x4xf32>
    tpu.vector_store %arg4[%c0_2, %c0_3, %c0_4], %16 {strides = array<i32>} : memref<2x16x4xf32, #tpu.memory_space<vmem>>, vector<2x16x4xf32>,
    %c0_5 = arith.constant 0 : index
    %c0_6 = arith.constant 0 : index
    %c0_7 = arith.constant 0 : index
    %19 = vector.load %arg3[%c0_5, %c0_6, %c0_7] : memref<2x16x4xf32, #tpu.memory_space<vmem>>, vector<2x16x4xf32>
    tpu.vector_store %arg3[%c0_5, %c0_6, %c0_7], %17 {strides = array<i32>} : memref<2x16x4xf32, #tpu.memory_space<vmem>>, vector<2x16x4xf32>,
    return
  }
  func.func @transform_0(%arg0: i32, %arg1: i32) -> (i32, i32, i32) {
    %c0_i32 = arith.constant 0 : i32
    %c0_i32_0 = arith.constant 0 : i32
    return %arg0, %c0_i32, %arg1 : i32, i32, i32
  }
  func.func @transform_1(%arg0: i32, %arg1: i32) -> (i32, i32, i32) {
    %c0_i32 = arith.constant 0 : i32
    %c0_i32_0 = arith.constant 0 : i32
    return %arg0, %c0_i32, %arg1 : i32, i32, i32
  }
  func.func @transform_2(%arg0: i32, %arg1: i32) -> (i32, i32, i32) {
    %c0_i32 = arith.constant 0 : i32
    %c0_i32_0 = arith.constant 0 : i32
    return %arg0, %c0_i32, %arg1 : i32, i32, i32
  }
}

</mosaic_0001>

<bundles_post_ra>
// kernel: series_decomp.1
= control target key start
LH: loop header
LB: loop body
LE: loop exit
PB: predicated region body
PF: predicated region fallthrough
CT: control target
= control target key end

     0   :  { %vm22_vm0 = vcmask 1041408   ;;  %vm43_vm1 = vcmask 1040384   ;;  %vm50_vm2 = vcmask 1042432   ;;  %vm57_vm3 = vcmask 1046528   ;;  %s254_s0 = inlined_call_operand.vmem [shape: f32[2,16,4], index: 0, kind: input, shape index: {}]   ;;  %s255_s2 = inlined_call_operand.vmem [shape: f32[2,16,4], index: 2, kind: output, shape index: {1}]   ;;  %s256_s1 = inlined_call_operand.vmem [shape: f32[2,16,4], index: 1, kind: output, shape index: {0}]  }
   0x1   :  { %v167_v0 = vld [vmem:[%s254_s0] sm:$0xff]  ;;  %v172_v1 = vld [vmem:[%s254_s0 + $0x8] sm:$0xff]  ;;  %v177_v2 = vld [vmem:[%s254_s0 + $0x10] sm:$0xff]  ;;  %vm86_vm4 = vcmask 1045504   ;;  %vm105_vm5 = vcmask 1043456   ;;  %vm132_vm6 = vcmask 31744  }
   0x2   :  { %v16_v3 = vrot.slane %v167_v0, 2  ;;  %v23_v4 = vrot.slane %v167_v0, 6  ;;  %v24_v5 = vrot.slane %v172_v1, 6  ;;  %v35_v6 = vrot.slane %v172_v1, 4  ;;  %v186_v7 = vld [vmem:[%s254_s0 + $0x18] sm:$0xff] }
   0x3   :  { %v39_v8 = vrot.slane %v172_v1, 2  ;;  %v17_v9 = vrot.slane %v177_v2, 2  ;;  %v26_v10 = vrot.slane %v177_v2, 6  ;;  %v27_v11 = vrot.slane %v186_v7, 6 }
   0x4   :  { %v25_v12 = vsel %vm22_vm0, %v23_v4, %v24_v5  ;;  %v44_v13 = vsel %vm43_vm1, %v16_v3, %v167_v0  ;;  %v48_v14 = vsel %vm22_vm0, %v24_v5, %v35_v6  ;;  %v36_v15 = vrot.slane %v186_v7, 4 }
   0x5   :  { %v46_v16 = vsel %vm22_vm0, %v44_v13, %v23_v4  ;;  %v51_v17 = vsel %vm50_vm2, %v48_v14, %v39_v8  ;;  %v59_v18 = vrot.slane %v25_v12, 1  ;;  %v107_v22 = vrot.slane %v25_v12, 4 }
   0x6   :  { %v58_v19 = vrot.slane %v46_v16, 1  ;;  %v61_v20 = vrot.slane %v51_v17, 1  ;;  %v106_v21 = vrot.slane %v46_v16, 4  ;;  %v28_v23 = vsel %vm22_vm0, %v26_v10, %v27_v11 }
   0x7   :  { %v40_v24 = vrot.slane %v186_v7, 2  ;;  %v45_v25 = vsel %vm43_vm1, %v17_v9, %v177_v2  ;;  %v49_v26 = vsel %vm22_vm0, %v27_v11, %v36_v15  ;;  %v109_v30 = vrot.slane %v51_v17, 4 }
   0x8   :  { %v60_v27 = vsel %vm57_vm3, %v58_v19, %v59_v18  ;;  %v62_v28 = vsel %vm57_vm3, %v59_v18, %v61_v20  ;;  %v76_v29 = vadd.f32 %v61_v20, %v51_v17  ;;  %v47_v33 = vsel %vm22_vm0, %v45_v25, %v26_v10 }
   0x9   :  { %v74_v31 = vadd.f32 %v60_v27, %v46_v16  ;;  %v75_v32 = vadd.f32 %v62_v28, %v25_v12  ;;  %v52_v35 = vsel %vm50_vm2, %v49_v26, %v40_v24  ;;  %v63_v36 = vrot.slane %v47_v33, 1 }
   0xa   :  { %v90_v34 = vrot.slane %v76_v29, 2  ;;  %v64_v37 = vrot.slane %v28_v23, 1  ;;  %v66_v40 = vrot.slane %v52_v35, 1  ;;  %v108_v41 = vsel %vm105_vm5, %v106_v21, %v107_v22 }
   0xb   :  { %v87_v38 = vrot.slane %v74_v31, 2  ;;  %v88_v39 = vrot.slane %v75_v32, 2  ;;  %v110_v42 = vsel %vm105_vm5, %v107_v22, %v109_v30  ;;  %v111_v44 = vrot.slane %v47_v33, 4 }
   0xc   :  { %v65_v43 = vsel %vm57_vm3, %v63_v36, %v64_v37  ;;  %v67_v47 = vsel %vm57_vm3, %v64_v37, %v66_v40  ;;  %v112_v52 = vrot.slane %v28_v23, 4  ;;  %v79_v54 = vadd.f32 %v66_v40, %v52_v35 }
   0xd   :  { %v89_v45 = vsel %vm86_vm4, %v87_v38, %v88_v39  ;;  %v91_v46 = vsel %vm86_vm4, %v88_v39, %v90_v34  ;;  %v77_v48 = vadd.f32 %v65_v43, %v47_v33  ;;  %v78_v51 = vadd.f32 %v67_v47, %v28_v23 }
   0xe   :  { %v101_v49 = vadd.f32 %v89_v45, %v74_v31  ;;  %v102_v50 = vadd.f32 %v91_v46, %v75_v32  ;;  %v114_v55 = vrot.slane %v52_v35, 4  ;;  %v95_v59 = vrot.slane %v79_v54, 2 }
   0xf   :  { %v92_v53 = vrot.slane %v77_v48, 2  ;;  %v93_v58 = vrot.slane %v78_v51, 2  ;;  %v113_v63 = vsel %vm105_vm5, %v111_v44, %v112_v52 }
  0x10   :  { %v120_v56 = vadd.f32 %v108_v41, %v101_v49  ;;  %v121_v57 = vadd.f32 %v110_v42, %v102_v50  ;;  %v115_v5 = vsel %vm105_vm5, %v112_v52, %v114_v55 }
  0x11   :  { %v94_v62 = vsel %vm86_vm4, %v92_v53, %v93_v58  ;;  %v96_v4 = vsel %vm86_vm4, %v93_v58, %v95_v59 }
  0x12   :  { %v124_v60 = vmul.f32 0.2, %v120_v56  ;;  %v125_v61 = vmul.f32 0.2, %v121_v57  ;;  %v103_v3 = vadd.f32 %v94_v62, %v77_v48  ;;  %v104_v6 = vadd.f32 %v96_v4, %v78_v51 }
  0x14   :  { %133 = vst.msk [vmem:[%s255_s2] sm:$0xff] %vm132_vm6, %v124_v60  ;;  %134 = vst.msk [vmem:[%s255_s2 + $0x8] sm:$0xff] %vm132_vm6, %v125_v61  ;;  %v128_v8 = vsub.f32 %v167_v0, %v124_v60  ;;  %v129_v9 = vsub.f32 %v172_v1, %v125_v61  ;;  %v122_v10 = vadd.f32 %v113_v63, %v103_v3 }
  0x15   :  { %v123_v11 = vadd.f32 %v115_v5, %v104_v6 }
  0x16   :  { %137 = vst.msk [vmem:[%s256_s1] sm:$0xff] %vm132_vm6, %v128_v8  ;;  %138 = vst.msk [vmem:[%s256_s1 + $0x8] sm:$0xff] %vm132_vm6, %v129_v9  ;;  %v126_v12 = vmul.f32 0.2, %v122_v10 }
  0x17   :  { %v127_v13 = vmul.f32 0.2, %v123_v11 }
  0x18   :  { %135 = vst.msk [vmem:[%s255_s2 + $0x10] sm:$0xff] %vm132_vm6, %v126_v12  ;;  %v130_v0 = vsub.f32 %v177_v2, %v126_v12 }
  0x19   :  { %136 = vst.msk [vmem:[%s255_s2 + $0x18] sm:$0xff] %vm132_vm6, %v127_v13  ;;  %v131_v1 = vsub.f32 %v186_v7, %v127_v13 }
  0x1a   :  { %139 = vst.msk [vmem:[%s256_s1 + $0x10] sm:$0xff] %vm132_vm6, %v130_v0 }
  0x1b   :  { %140 = vst.msk [vmem:[%s256_s1 + $0x18] sm:$0xff] %vm132_vm6, %v131_v1 }

</bundles_post_ra>
